<compile_context>
chip_gen: v7x
topology: tpu7x:2x2x1
jax: 0.10.0
libtpu: 0.0.40
codegen_flags: <defaults>
</compile_context>

<pallas_src>
import functools

import jax
import jax.numpy as jnp
from jax.experimental import pallas as pl
from jax.experimental.pallas import tpu as pltpu

LANE = 128


def _logistic_loss_kernel(p_ref, t_ref, out_ref, acc_ref, *,
                          n, blk_rows, cpc, apply_mask):
    """Streaming logistic-loss partial-sum kernel.

    p_ref, t_ref : (blk_rows, 128) tiles in VMEM (native dtypes)
    out_ref      : (1, 1) f32 SMEM -- this core's partial sum
    acc_ref      : (blk_rows, 128) f32 VMEM running accumulator (per core)
    """
    c = pl.program_id(0)          # core (parallel) axis
    j = pl.program_id(1)          # chunk (reduction) axis

    @pl.when(j == 0)
    def _():
        acc_ref[...] = jnp.zeros_like(acc_ref)

    # Cast under the DMA; do the math in f32 (v5e VPU/EUP have no bf16 path).
    p = p_ref[...].astype(jnp.float32)
    tsign = t_ref[...].astype(jnp.float32) * 2.0 - 1.0      # {0,1} -> {-1,+1}
    x = p * tsign

    # Numerically stable softplus(-x) == log(1 + exp(-x)); exp arg is <= 0.
    vals = jnp.maximum(-x, 0.0) + jnp.log(1.0 + jnp.exp(-jnp.abs(x)))

    if apply_mask:
        # Mask the ragged tail and any clamped/duplicated out-of-range block.
        blk = c * cpc + j                                    # logical chunk id
        base = blk * (blk_rows * LANE)
        row_ids = jax.lax.broadcasted_iota(jnp.int32, (blk_rows, LANE), 0)
        col_ids = jax.lax.broadcasted_iota(jnp.int32, (blk_rows, LANE), 1)
        flat = base + row_ids * LANE + col_ids
        vals = jnp.where(flat < n, vals, 0.0)

    acc_ref[...] += vals                                     # pure VPU add

    @pl.when(j == pl.num_programs(1) - 1)
    def _():
        out_ref[0, 0] = jnp.sum(acc_ref[...])                # one XLU reduce


@functools.partial(jax.jit, static_argnames=("block_rows",))
def logistic_loss(predictions, target, block_rows=1024):
    p = predictions.reshape(-1)          # keep native dtype (no astype copies)
    t = target.reshape(-1)
    n = p.shape[0]
    if n == 0:
        return jnp.array(jnp.nan, dtype=jnp.float32)         # mean of empty

    # Lane-major 2-D view; pad (<128 elems) only if n is not a multiple of 128.
    rows = (n + LANE - 1) // LANE
    pad = rows * LANE - n
    if pad:
        p = jnp.pad(p, (0, pad))
        t = jnp.pad(t, (0, pad))
    p2 = p.reshape(rows, LANE)
    t2 = t.reshape(rows, LANE)

    # Tile choice: big streaming blocks; small inputs get one full-extent block.
    if rows <= block_rows:
        blk_rows = rows                               # full-dim block is legal
    else:
        blk_rows = max(8, (block_rows // 8) * 8)      # (8,128) divisibility

    chunks = (rows + blk_rows - 1) // blk_rows        # total reduction steps
    num_cores = 2 if chunks >= 2 else 1               # v7x megacore split
    cpc = (chunks + num_cores - 1) // num_cores       # chunks per core

    # Mask only if there is a ragged tail or a duplicated (clamped) block.
    apply_mask = (n != chunks * blk_rows * LANE) or (chunks != num_cores * cpc)

    def in_index(c, j):
        # Clamp so the (rare) extra block on the last core reads in-bounds;
        # its contribution is masked to zero in-kernel.
        return (jnp.minimum(c * cpc + j, chunks - 1), 0)

    kernel = functools.partial(
        _logistic_loss_kernel,
        n=n, blk_rows=blk_rows, cpc=cpc, apply_mask=apply_mask)

    partials = pl.pallas_call(
        kernel,
        out_shape=jax.ShapeDtypeStruct((num_cores, 1), jnp.float32),
        grid_spec=pltpu.PrefetchScalarGridSpec(
            num_scalar_prefetch=0,
            grid=(num_cores, cpc),
            in_specs=[
                pl.BlockSpec((blk_rows, LANE), in_index),
                pl.BlockSpec((blk_rows, LANE), in_index),
            ],
            out_specs=pl.BlockSpec((1, 1), lambda c, j: (c, 0),
                                   memory_space=pltpu.SMEM),
            scratch_shapes=[pltpu.VMEM((blk_rows, LANE), jnp.float32)],
        ),
        compiler_params=pltpu.CompilerParams(
            dimension_semantics=("parallel", "arbitrary")),
    )(p2, t2)

    return jnp.sum(partials) / jnp.float32(n)


if __name__ == "__main__":
    key = jax.random.PRNGKey(0)
    kp, kt, kp2, kt2 = jax.random.split(key, 4)

    # Test 1: NCHW f32, element count divisible by 128 (mask-free fast path).
    predictions = jax.random.normal(kp, (2, 4, 16, 16), dtype=jnp.float32)
    target = jax.random.bernoulli(kt, 0.5, (2, 4, 16, 16)).astype(jnp.float32)

    out = jax.block_until_ready(logistic_loss(predictions, target))

    t_sign = target.reshape(-1) * 2.0 - 1.0
    ref = jnp.mean(jnp.log(1.0 + jnp.exp(-(predictions.reshape(-1) * t_sign))))
    assert jnp.allclose(out, ref, rtol=1e-5, atol=1e-5), (out, ref)

    # Test 2: ragged size (not a multiple of 128) + bf16 predictions,
    # exercising the in-kernel tail mask and native-dtype streaming.
    p_bf16 = jax.random.normal(kp2, (3, 5, 7, 11),
                               dtype=jnp.float32).astype(jnp.bfloat16)
    t_f32 = jax.random.bernoulli(kt2, 0.5, (3, 5, 7, 11)).astype(jnp.float32)

    out2 = jax.block_until_ready(logistic_loss(p_bf16, t_f32))

    p2f = p_bf16.astype(jnp.float32).reshape(-1)
    t2s = t_f32.reshape(-1) * 2.0 - 1.0
    ref2 = jnp.mean(jnp.log(1.0 + jnp.exp(-(p2f * t2s))))
    assert jnp.allclose(out2, ref2, rtol=1e-5, atol=1e-5), (out2, ref2)

    print("KERNEL_OK")
</pallas_src>

<mosaic_0001>
module attributes {stable_mosaic.version = 11 : i64} {
  func.func @_logistic_loss_kernel(%arg0: i32, %arg1: i32, %arg2: memref<16x128xf32, #tpu.memory_space<vmem>>, %arg3: memref<16x128xf32, #tpu.memory_space<vmem>>, %arg4: memref<1x1xf32, #tpu.memory_space<smem>>, %arg5: memref<16x128xf32, #tpu.memory_space<vmem>>) attributes {dimension_semantics = [#tpu.dimension_semantics<parallel>, #tpu.dimension_semantics<arbitrary>], iteration_bounds = array<i64: 1, 1>, scalar_prefetch = 0 : i64, scratch_operands = 1 : i64, tpu.core_type = #tpu.core_type<tc>, window_params = [{transform_indices = @transform_0, window_bounds = array<i64: 16, 128>}, {transform_indices = @transform_1, window_bounds = array<i64: 16, 128>}, {transform_indices = @transform_2, window_bounds = array<i64: 1, 1>}]} {
    %c0_i32 = arith.constant 0 : i32
    %0 = arith.cmpi eq, %arg1, %c0_i32 : i32
    %1 = arith.extui %0 : i1 to i32
    %c0_i32_0 = arith.constant 0 : i32
    %2 = arith.cmpi ne, %1, %c0_i32_0 : i32
    scf.if %2 {
      %cst_15 = arith.constant 0.000000e+00 : f32
      %28 = vector.broadcast %cst_15 : f32 to vector<16x128xf32>
      %c0_16 = arith.constant 0 : index
      %c0_17 = arith.constant 0 : index
      %29 = vector.load %arg5[%c0_16, %c0_17] : memref<16x128xf32, #tpu.memory_space<vmem>>, vector<16x128xf32>
      tpu.vector_store %arg5[%c0_16, %c0_17], %28 {strides = array<i32>} : memref<16x128xf32, #tpu.memory_space<vmem>>, vector<16x128xf32>,
    } else {
    }
    %c0 = arith.constant 0 : index
    %c0_1 = arith.constant 0 : index
    %3 = vector.load %arg2[%c0, %c0_1] : memref<16x128xf32, #tpu.memory_space<vmem>>, vector<16x128xf32>
    %c0_2 = arith.constant 0 : index
    %c0_3 = arith.constant 0 : index
    %4 = vector.load %arg3[%c0_2, %c0_3] : memref<16x128xf32, #tpu.memory_space<vmem>>, vector<16x128xf32>
    %cst = arith.constant 2.000000e+00 : f32
    %5 = vector.broadcast %cst : f32 to vector<16x128xf32>
    %6 = arith.mulf %4, %5 : vector<16x128xf32>
    %cst_4 = arith.constant 1.000000e+00 : f32
    %7 = vector.broadcast %cst_4 : f32 to vector<16x128xf32>
    %8 = arith.subf %6, %7 : vector<16x128xf32>
    %9 = arith.mulf %3, %8 : vector<16x128xf32>
    %cst_5 = arith.constant 0.000000e+00 : f32
    %10 = vector.broadcast %cst_5 : f32 to vector<16x128xf32>
    %11 = arith.subf %10, %9 : vector<16x128xf32>
    %cst_6 = arith.constant 0.000000e+00 : f32
    %12 = vector.broadcast %cst_6 : f32 to vector<16x128xf32>
    %13 = arith.maximumf %11, %12 : vector<16x128xf32>
    %14 = math.absf %9 : vector<16x128xf32>
    %cst_7 = arith.constant 0.000000e+00 : f32
    %15 = vector.broadcast %cst_7 : f32 to vector<16x128xf32>
    %16 = arith.subf %15, %14 : vector<16x128xf32>
    %17 = math.exp %16 : vector<16x128xf32>
    %cst_8 = arith.constant 1.000000e+00 : f32
    %18 = vector.broadcast %cst_8 : f32 to vector<16x128xf32>
    %19 = arith.addf %18, %17 : vector<16x128xf32>
    %20 = math.log %19 : vector<16x128xf32>
    %21 = arith.addf %13, %20 : vector<16x128xf32>
    %c0_9 = arith.constant 0 : index
    %c0_10 = arith.constant 0 : index
    %22 = vector.load %arg5[%c0_9, %c0_10] : memref<16x128xf32, #tpu.memory_space<vmem>>, vector<16x128xf32>
    %23 = arith.addf %22, %21 : vector<16x128xf32>
    %c0_11 = arith.constant 0 : index
    %c0_12 = arith.constant 0 : index
    %24 = vector.load %arg5[%c0_11, %c0_12] : memref<16x128xf32, #tpu.memory_space<vmem>>, vector<16x128xf32>
    tpu.vector_store %arg5[%c0_11, %c0_12], %23 {strides = array<i32>} : memref<16x128xf32, #tpu.memory_space<vmem>>, vector<16x128xf32>,
    %c0_i32_13 = arith.constant 0 : i32
    %25 = arith.cmpi eq, %arg1, %c0_i32_13 : i32
    %26 = arith.extui %25 : i1 to i32
    %c0_i32_14 = arith.constant 0 : i32
    %27 = arith.cmpi ne, %26, %c0_i32_14 : i32
    scf.if %27 {
      %c0_15 = arith.constant 0 : index
      %c0_16 = arith.constant 0 : index
      %28 = vector.load %arg5[%c0_15, %c0_16] : memref<16x128xf32, #tpu.memory_space<vmem>>, vector<16x128xf32>
      %29 = vector.shape_cast %28 : vector<16x128xf32> to vector<1x16x128xf32>
      %cst_17 = arith.constant dense<0.000000e+00> : vector<1xf32>
      %30 = vector.multi_reduction <add>, %29, %cst_17 [1, 2] : vector<1x16x128xf32> to vector<1xf32>
      %31 = vector.shape_cast %30 : vector<1xf32> to vector<1x1x1xf32>
      %32 = vector.extract %31[0, 0, 0] : f32 from vector<1x1x1xf32>
      %c0_18 = arith.constant 0 : index
      %c0_19 = arith.constant 0 : index
      %33 = memref.load %arg4[%c0_18, %c0_19] : memref<1x1xf32, #tpu.memory_space<smem>>
      memref.store %32, %arg4[%c0_18, %c0_19] : memref<1x1xf32, #tpu.memory_space<smem>>
    } else {
    }
    return
  }
  func.func @transform_0(%arg0: i32, %arg1: i32) -> (i32, i32) {
    %c1_i32 = arith.constant 1 : i32
    %0 = arith.muli %arg0, %c1_i32 : i32
    %1 = arith.addi %0, %arg1 : i32
    %c0_i32 = arith.constant 0 : i32
    %2 = arith.minsi %1, %c0_i32 : i32
    %c0_i32_0 = arith.constant 0 : i32
    %c0_i32_1 = arith.constant 0 : i32
    return %2, %c0_i32_0 : i32, i32
  }
  func.func @transform_1(%arg0: i32, %arg1: i32) -> (i32, i32) {
    %c1_i32 = arith.constant 1 : i32
    %0 = arith.muli %arg0, %c1_i32 : i32
    %1 = arith.addi %0, %arg1 : i32
    %c0_i32 = arith.constant 0 : i32
    %2 = arith.minsi %1, %c0_i32 : i32
    %c0_i32_0 = arith.constant 0 : i32
    %c0_i32_1 = arith.constant 0 : i32
    return %2, %c0_i32_0 : i32, i32
  }
  func.func @transform_2(%arg0: i32, %arg1: i32) -> (i32, i32) {
    %c0_i32 = arith.constant 0 : i32
    %c0_i32_0 = arith.constant 0 : i32
    return %arg0, %c0_i32 : i32, i32
  }
}

</mosaic_0001>

<bundles_post_ra>
// kernel: logistic_loss.1
= control target key start
LH: loop header
LB: loop body
LE: loop exit
PB: predicated region body
PF: predicated region fallthrough
CT: control target
= control target key end

     0   :  { %s225_s0 = inlined_call_operand.vmem [shape: f32[16,128], index: 0, kind: input, shape index: {}]   ;;  %s226_s1 = inlined_call_operand.vmem [shape: f32[16,128], index: 1, kind: input, shape index: {}]   ;;  %s227_s2 = inlined_call_operand.hbm [shape: f32[1,1], index: 2, kind: output, shape index: {}]  }
   0x1   :  { %v84_v0 = vld [vmem:[%s226_s1] sm:$0xff]  ;;  %v85_v1 = vld [vmem:[%s226_s1 + $0x8] sm:$0xff] }
   0x2   :  { %v86_v2 = vmul.f32 2.0, %v84_v0 }
   0x3   :  { %7 = vsyncpa [#allocation4], 0  ;;  %v82_v3 = vld [vmem:[%s225_s0] sm:$0xff]  ;;  %v87_v4 = vmul.f32 2.0, %v85_v1  ;;  %v83_v5 = vld [vmem:[%s225_s0 + $0x8] sm:$0xff]  ;;  %s173_s18 = scalar_lea.hbm %s227_s2, 16 }
   0x4   :  { %v160_v6 = vadd.f32 -1.0, %v86_v2  ;;  %p174_p0 = scmp.ne.s32.totalorder %s227_s2, %s173_s18  ;;  %p177_p1 = scmp.lt.u32.totalorder %s173_s18, %s227_s2 }
   0x5   :  { %v161_v7 = vadd.f32 -1.0, %v87_v4 }
   0x6   :  { %v90_v8 = vmul.f32 %v160_v6, %v82_v3  ;;  %p179_p2 = pnand %p177_p1, %p174_p0 }
   0x7   :  { %v91_v9 = vmul.f32 %v161_v7, %v83_v5 }
   0x8   :  { %v96_v10 = vand.u32 2147483647, %v90_v8  ;;  %v92_v20 = vsub.f32 0.0, %v90_v8 }
   0x9   :  { %v97_v11 = vand.u32 2147483647, %v91_v9  ;;  %v93_v21 = vsub.f32 0.0, %v91_v9 }
   0xa   :  { %v98_v12 = vsub.f32 0.0, %v96_v10  ;;  %v94_v22 = vmax.f32 %v92_v20, 0.0 }
   0xb   :  { %v99_v13 = vsub.f32 0.0, %v97_v11  ;;  %v95_v24 = vmax.f32 %v93_v21, 0.0 }
   0xc   :  { %v100_v14 = vmul.f32 1.442695, %v98_v12 }
   0xd   :  { %v102_v15 = vmul.f32 1.442695, %v99_v13 }
   0xe   :  { %165 = vpow2.f32 %v100_v14 }
   0xf   :  { %167 = vpow2.f32 %v102_v15 }
  0x18   :  { %v166_v16 = vpop.eup %165 }
  0x19   :  { %v168_v17 = vpop.eup %167  ;;  %v104_v18 = vadd.f32 1.0, %v166_v16 }
  0x1a   :  { %v105_v19 = vadd.f32 1.0, %v168_v17 }
  0x1b   :  { %169 = vlog2.f32 %v104_v18 }
  0x1c   :  { %171 = vlog2.f32 %v105_v19 }
  0x25   :  { %v170_v23 = vpop.eup %169 }
  0x26   :  { %v172_v25 = vpop.eup %171  ;;  %v107_v26 = vmul.f32 0.6931472, %v170_v23 }
  0x27   :  { %v109_v27 = vmul.f32 0.6931472, %v172_v25 }
  0x28   :  { %v110_v28 = vadd.f32 %v107_v26, %v94_v22 }
  0x29   :  { %v111_v29 = vadd.f32 %v109_v27, %v95_v24 }
  0x2b   :  { %v123_v30 = vadd.f32 %v111_v29, %v110_v28 }
  0x2d   :  { %124 = vadd.xlane.f32.xlu0 %v123_v30 }
  0xba   :  { %v125_v31 = vpop.xlane.xlu0 %124 }
  0xbb   :  { %v126_v32 = vrot.slane %v125_v31, 4 }
  0xbd   :  { %v127_v33 = vadd.f32 %v126_v32, %v125_v31 }
  0xbf   :  { %v128_v34 = vrot.slane %v127_v33, 2 }
  0xc1   :  { %v129_v35 = vadd.f32 %v128_v34, %v127_v33 }
  0xc3   :  { %v130_v36 = vrot.slane %v129_v35, 1 }
  0xc5   :  { %v131_v37 = vadd.f32 %v130_v36, %v129_v35 }
  0xc7   :  { %162 = vpush %v131_v37 }
  0xf8   :  { %s163_s0 = spop %162 }
  0xf9   :  { %134 = sst [smem:[#allocation3]] %s163_s0 }
  0xfa   :  { %182 = shalt.err (!%p179_p2)
}
  0xfb   :  { %s185_s23 = smov [#allocation3]  }
  0xfc   :  { %142 = dma.smem_to_hbm %s185_s23, 16, %s227_s2, [#allocation4]  }
  0xfd   :  { %183 = dma.done.wait [#allocation4], 16  }
  0xfe   :  { %184 = vsyncadd [#allocation4], 4294967280 }
  0xff   :  { %146 = sfence }
 0x100   :  { %147 = vsyncpa [#allocation4], 1 }

</bundles_post_ra>
